<compile_context>
chip_gen: v7x
topology: tpu7x:2x2x1
jax: 0.10.0
libtpu: 0.0.40
codegen_flags: <defaults>
</compile_context>

<pallas_src>
import jax
import jax.numpy as jnp
import numpy as np
from jax.experimental import pallas as pl
from jax.experimental.pallas import tpu as pltpu


def _detection_head_kernel(x_ref, w_ref, b_ref, o_ref):
    """One row-tile of the fused 1x1-conv matmul.

    x_ref: (TR, C_in)       bf16 activations (pixels on sublanes, C_in on lanes)
    w_ref: (C_in, C_out_p)  bf16 weights, lane-dense (C_out padded to mult of 128)
    b_ref: (1, C_out_p)     f32 bias
    o_ref: (TR, C_out_p)    f32 output tile (unmasked, lane-dense stores)
    """
    acc = jnp.dot(x_ref[...], w_ref[...], preferred_element_type=jnp.float32)
    o_ref[...] = (acc + b_ref[...]).astype(o_ref.dtype)


def detection_head_pallas(x_nchw, weight, bias, *, row_tile=128):
    """DetectionHead forward.  x_nchw: (N, C_in, H, W) f32,
    weight: (C_out, C_in, 1, 1) f32 (PyTorch layout), bias: (C_out,) f32."""
    N, C_in, H, W = x_nchw.shape
    C_out = weight.shape[0]

    # Lane-dense padded output channel count (multiple of 128 -> unmasked vst).
    C_out_p = int(pl.cdiv(C_out, 128)) * 128

    # NCHW -> NHWC -> (rows, C_in); rows padded up to a multiple of the tile.
    R = N * H * W
    R_p = int(pl.cdiv(R, row_tile)) * row_tile
    x_flat = jnp.transpose(x_nchw, (0, 2, 3, 1)).reshape(R, C_in)
    if R_p != R:
        x_flat = jnp.pad(x_flat, ((0, R_p - R), (0, 0)))
    x_flat = x_flat.astype(jnp.bfloat16)

    # (C_out, C_in, 1, 1) -> (C_in, C_out_p) bf16; bias -> (1, C_out_p) f32.
    w = jnp.transpose(weight.reshape(C_out, C_in), (1, 0))
    w = jnp.pad(w, ((0, 0), (0, C_out_p - C_out))).astype(jnp.bfloat16)
    b = jnp.pad(bias.astype(jnp.float32),
                ((0, C_out_p - C_out),)).reshape(1, C_out_p)

    grid = (R_p // row_tile,)
    out_flat = pl.pallas_call(
        _detection_head_kernel,
        out_shape=jax.ShapeDtypeStruct((R_p, C_out_p), jnp.float32),
        grid_spec=pltpu.PrefetchScalarGridSpec(
            num_scalar_prefetch=0,
            grid=grid,
            in_specs=[
                pl.BlockSpec((row_tile, C_in), lambda i: (i, 0)),
                pl.BlockSpec((C_in, C_out_p), lambda i: (0, 0)),
                pl.BlockSpec((1, C_out_p), lambda i: (0, 0)),
            ],
            out_specs=pl.BlockSpec((row_tile, C_out_p), lambda i: (i, 0)),
        ),
        compiler_params=pltpu.CompilerParams(
            dimension_semantics=("parallel",)),
    )(x_flat, w, b)

    # Strip padding, back to NCHW (PyTorch convention).
    out = out_flat[:R, :C_out].reshape(N, H, W, C_out)
    return jnp.transpose(out, (0, 3, 1, 2))


def detection_head_reference(x_nchw, weight, bias):
    """Pure-JAX reference with the same bf16-input / f32-accumulate numerics."""
    N, C_in, H, W = x_nchw.shape
    C_out = weight.shape[0]
    x_bf = x_nchw.astype(jnp.bfloat16).astype(jnp.float32)
    w_bf = weight.reshape(C_out, C_in).astype(jnp.bfloat16).astype(jnp.float32)
    out = jnp.einsum("nchw,oc->nohw", x_bf, w_bf)
    return out + bias.reshape(1, C_out, 1, 1)


if __name__ == "__main__":
    key = jax.random.PRNGKey(0)
    kx, kw, kb = jax.random.split(key, 3)

    # Small shapes consistent with the module: a 16x16 feature map with 64
    # channels feeding the default head (3 anchors x (80 classes + 5) = 255).
    N, C_in, H, W = 2, 64, 16, 16
    num_classes, num_anchors = 80, 3
    C_out = num_anchors * (num_classes + 5)  # 255

    x = jax.random.normal(kx, (N, C_in, H, W), jnp.float32)
    bound = 1.0 / np.sqrt(C_in)  # PyTorch default Conv2d init range
    weight = jax.random.uniform(kw, (C_out, C_in, 1, 1), jnp.float32,
                                minval=-bound, maxval=bound)
    bias = jax.random.uniform(kb, (C_out,), jnp.float32,
                              minval=-bound, maxval=bound)

    out = jax.block_until_ready(detection_head_pallas(x, weight, bias))
    ref = jax.block_until_ready(detection_head_reference(x, weight, bias))

    assert out.shape == (N, C_out, H, W), out.shape
    np.testing.assert_allclose(np.asarray(out), np.asarray(ref),
                               rtol=2e-3, atol=2e-3)
    print("KERNEL_OK")
</pallas_src>

<mosaic_0001>
module attributes {stable_mosaic.version = 11 : i64} {
  func.func @_detection_head_kernel(%arg0: i32, %arg1: memref<128x64xbf16, #tpu.memory_space<vmem>>, %arg2: memref<64x256xbf16, #tpu.memory_space<vmem>>, %arg3: memref<1x256xf32, #tpu.memory_space<vmem>>, %arg4: memref<128x256xf32, #tpu.memory_space<vmem>>) attributes {dimension_semantics = [#tpu.dimension_semantics<parallel>], iteration_bounds = array<i64: 4>, scalar_prefetch = 0 : i64, scratch_operands = 0 : i64, tpu.core_type = #tpu.core_type<tc>, window_params = [{transform_indices = @transform_0, window_bounds = array<i64: 128, 64>}, {pipeline_mode = #tpu.pipeline_mode<synchronous>, transform_indices = @transform_1, window_bounds = array<i64: 64, 256>}, {pipeline_mode = #tpu.pipeline_mode<synchronous>, transform_indices = @transform_2, window_bounds = array<i64: 1, 256>}, {transform_indices = @transform_3, window_bounds = array<i64: 128, 256>}]} {
    %c0 = arith.constant 0 : index
    %c0_0 = arith.constant 0 : index
    %0 = vector.load %arg1[%c0, %c0_0] : memref<128x64xbf16, #tpu.memory_space<vmem>>, vector<128x64xbf16>
    %c0_1 = arith.constant 0 : index
    %c0_2 = arith.constant 0 : index
    %1 = vector.load %arg2[%c0_1, %c0_2] : memref<64x256xbf16, #tpu.memory_space<vmem>>, vector<64x256xbf16>
    %cst = arith.constant dense<0.000000e+00> : vector<128x256xf32>
    %2 = tpu.matmul %0, %1, %cst {dimension_numbers = #tpu.dot_dimension_numbers<[1], [0], [0], [1], [0, 0, 1, 1], [], []>} : vector<128x64xbf16>, vector<64x256xbf16>, vector<128x256xf32> -> vector<128x256xf32>
    %c0_3 = arith.constant 0 : index
    %c0_4 = arith.constant 0 : index
    %3 = vector.load %arg3[%c0_3, %c0_4] : memref<1x256xf32, #tpu.memory_space<vmem>>, vector<1x256xf32>
    %4 = vector.broadcast %3 : vector<1x256xf32> to vector<128x256xf32>
    %5 = arith.addf %2, %4 : vector<128x256xf32>
    %c0_5 = arith.constant 0 : index
    %c0_6 = arith.constant 0 : index
    %6 = vector.load %arg4[%c0_5, %c0_6] : memref<128x256xf32, #tpu.memory_space<vmem>>, vector<128x256xf32>
    tpu.vector_store %arg4[%c0_5, %c0_6], %5 {strides = array<i32>} : memref<128x256xf32, #tpu.memory_space<vmem>>, vector<128x256xf32>,
    return
  }
  func.func @transform_0(%arg0: i32) -> (i32, i32) {
    %c0_i32 = arith.constant 0 : i32
    %c0_i32_0 = arith.constant 0 : i32
    return %arg0, %c0_i32 : i32, i32
  }
  func.func @transform_1(%arg0: i32) -> (i32, i32) {
    %c0_i32 = arith.constant 0 : i32
    %c0_i32_0 = arith.constant 0 : i32
    %c0_i32_1 = arith.constant 0 : i32
    return %c0_i32, %c0_i32_0 : i32, i32
  }
  func.func @transform_2(%arg0: i32) -> (i32, i32) {
    %c0_i32 = arith.constant 0 : i32
    %c0_i32_0 = arith.constant 0 : i32
    %c0_i32_1 = arith.constant 0 : i32
    return %c0_i32, %c0_i32_0 : i32, i32
  }
  func.func @transform_3(%arg0: i32) -> (i32, i32) {
    %c0_i32 = arith.constant 0 : i32
    %c0_i32_0 = arith.constant 0 : i32
    return %arg0, %c0_i32 : i32, i32
  }
}

</mosaic_0001>

<bundles_post_ra>
// kernel: tpu_custom_call.1
= control target key start
LH: loop header
LB: loop body
LE: loop exit
PB: predicated region body
PF: predicated region fallthrough
CT: control target
= control target key end

     0   :  { %8 = vsyncpa [#allocation3], 0  ;;  %s955_s0 = inlined_call_operand.vmem [shape: bf16[512,64], index: 0, kind: input, shape index: {}]   ;;  %s956_s1 = inlined_call_operand.vmem [shape: bf16[64,256], index: 1, kind: input, shape index: {}]   ;;  %s957_s2 = inlined_call_operand.vmem [shape: f32[1,256], index: 2, kind: input, shape index: {}]   ;;  %s958_s3 = inlined_call_operand.hbm [shape: f32[512,256], index: 3, kind: output, shape index: {}]  }
   0x1   :  { %10 = vsyncpa [#allocation3 + $0x1], 0  ;;  %s733_s12 = smov 0   ;;  %s735_s13 = smov 0  }
   0x2   :  { %s737_s14 = smov 0   ;;  %s739_s15 = smov 0  }
   0x3 LB: > { %s754_s16 = sadd.s32 4294967295, %s707_s15   ;;  %s536_s17 = sadd.s32 4294967294, %s707_s15   ;;  %s707_s15 = sphi %s739_s15, %s964_s15   ;;  %s703_s14 = sphi %s737_s14, %s963_s14   ;;  %s699_s13 = sphi %s735_s13, %s962_s13   ;;  %s695_s12 = sphi %s733_s12, %s961_s12  }
   0x4   : > { %s758_s18 = sadd.s32 1, %s707_s15   ;;  %s91_s19 = sadd.s32 1, %s703_s14 }
   0x5   : > { %s88_s20 = ssub.s32 %s707_s15, %s758_s18  ;;  %p101_p0 = scmp.ne.s32.totalorder %s703_s14, %s699_s13 }
   0x6   : > { %p89_p1 = scmp.eq.s32.totalorder %s88_s20, 0  ;;  %p102_p2 = scmp.eq.s32.totalorder %s754_s16, 3 }
   0x7   : > { %p107_p3 = scmp.ne.s32.totalorder %s699_s13, %s695_s12  ;;  %p108_p4 = scmp.eq.s32.totalorder %s536_s17, 3 }
   0x8   : > { %s769_s21 = scalar_select %p89_p1, %s703_s14, %s91_s19  }
   0x9   : > { %p771_p5 = por %p102_p2, %p101_p0  ;;  %p775_p6 = por %p108_p4, %p107_p3 }
   0xa   : > { %p539_p7 = scmp.ge.s32.totalorder %s707_s15, 1  ;;  %p141_p8 = scmp.lt.s32.totalorder %s707_s15, 5 }
   0xc   : > { %p142_p9 = pnand %p539_p7, %p141_p8 }
   0xd   : > { %v625_v0 = vld [vmem:[%s956_s1 + $0x4] ss:$8 sps:$4 sm:$0xff] (!%p142_p9)   ;;  %s541_s26 = sshll.u32 (!%p142_p9), %s754_s16, 4  ;;  %v627_v1 = vld [vmem:[%s956_s1] ss:$8 sps:$4 sm:$0xff] (!%p142_p9)   ;;  %v709_v2 = vmov (!%p142_p9), 0   ;;  %v199_v17 = vlaneseq (!%p142_p9) }
   0xe   : > { %145 = sbr.rel (%p142_p9) target bundleno = 287 (0x11f), region = 32  ;;  %346 = vmatprep.mubr.bf16.mxu0 (!%p142_p9), %v709_v2  ;;  %386 = vmatprep.mubr.bf16.mxu1 (!%p142_p9), %v709_v2  ;;  %p166_p10 = scmp.lt.s32.totalorder (!%p142_p9), %s541_s26, 63  ;;  %v628_v3 = vld [vmem:[%s956_s1 + $0x14] ss:$8 sps:$4 sm:$0xff] (!%p142_p9)   ;;  %v630_v4 = vld [vmem:[%s956_s1 + $0x10] ss:$8 sps:$4 sm:$0xff] (!%p142_p9)  }
   0xf   : > { %314 = vmatprep.subr.bf16.mxu0 (!%p142_p9), %v625_v0  ;;  %575 = vmatprep.subr.bf16.mxu1 (!%p142_p9), %v625_v0  ;;  %v631_v5 = vld [vmem:[%s956_s1 + $0x24] ss:$8 sps:$4 sm:$0xff] (!%p142_p9)   ;;  %v633_v6 = vld [vmem:[%s956_s1 + $0x20] ss:$8 sps:$4 sm:$0xff] (!%p142_p9)   ;;  %v634_v7 = vld [vmem:[%s956_s1 + $0x34] ss:$8 sps:$4 sm:$0xff] (!%p142_p9)  }
  0x10   : > { %315 = vmatpush1.bf16.msra.mxu0 (!%p142_p9), %v627_v1  ;;  %579 = vmatpush1.bf16.msra.mxu1 (!%p142_p9), %v627_v1  ;;  %v636_v8 = vld [vmem:[%s956_s1 + $0x30] ss:$8 sps:$4 sm:$0xff] (!%p142_p9)   ;;  %vm289_vm0 = vcmask (!%p142_p9), 523264   ;;  %v200_v18 = vshrl.u32 (!%p142_p9), %v199_v17, 7  ;;  %s162_s27 = sand.u32 (!%p142_p9), 1, %s699_s13   ;;  %s574_s5 = sshll.u32 (!%p142_p9), %s754_s16, 12 }
  0x11   : > { %316 = vmatprep.subr.bf16.mxu0 (!%p142_p9), %v628_v3  ;;  %576 = vmatprep.subr.bf16.mxu1 (!%p142_p9), %v628_v3  ;;  %v197_v20 = vld [vmem:[%s957_s2] sm:$0x3] (!%p142_p9)  ;;  %s540_s30 = sshll.u32 (!%p142_p9), %s162_s27, 8  ;;  %s914_s9 = scalar_lea.sflag (!%p142_p9), [#allocation3], %s162_s27 }
  0x12   : > { %v201_v19 = vsub.s32 (!%p142_p9), 0, %v200_v18  ;;  %v205_v21 = vsub.s32 (!%p142_p9), 1, %v200_v18  ;;  %s841_s4 = scalar_lea.vmem (!%p142_p9), [#allocation2], %s540_s30 }
  0x13   : > { %s474_s6 = sshll.u32 (!%p142_p9), %s841_s4, 4  ;;  %s902_s6 = int_to_ptr.vmem [resolvable:$true] %s474_s6 }
  0x14   : > { %317 = vmatpush1.bf16.msra.mxu0 (!%p142_p9), %v630_v4  ;;  %580 = vmatpush1.bf16.msra.mxu1 (!%p142_p9), %v630_v4  ;;  %v833_v22 = vrot.slane (!%p142_p9), %v197_v20, %v201_v19  ;;  %v835_v23 = vrot.slane (!%p142_p9), %v197_v20, %v205_v21  ;;  %s645_s10 = scalar_lea.vmem (!%p142_p9), %s902_s6, 4096 }
  0x15   : > { %s966_s26 = smov (!%p166_p10, %s541_s26), 63  ;;  %318 = vmatprep.subr.bf16.mxu0 %v631_v5  ;;  %577 = vmatprep.subr.bf16.mxu1 %v631_v5  ;;  %p646_p11 = scmp.ne.s32.totalorder %s902_s6, %s645_s10 }
  0x16   : > { %s542_s8 = sshll.u32 %s966_s26, 2 }
  0x17   : > { %s800_s11 = scalar_lea.vmem %s955_s0, %s542_s8  ;;  %s900_s8 = scalar_lea.hbm %s958_s3, %s574_s5 }
  0x18   : > { %319 = vmatpush1.bf16.msra.mxu0 %v633_v6  ;;  %581 = vmatpush1.bf16.msra.mxu1 %v633_v6  ;;  %v637_v9 = vld [vmem:[%s800_s11] sm:$0xff]   ;;  %v639_v11 = vld [vmem:[%s800_s11 + $0x8] sm:$0xff]   ;;  %v641_v13 = vld [vmem:[%s800_s11 + $0x10] sm:$0xff]   ;;  %p647_p12 = pnand %p646_p11, %p771_p5 }
  0x19   : > { %320 = vmatprep.subr.bf16.mxu0 %v634_v7  ;;  %578 = vmatprep.subr.bf16.mxu1 %v634_v7  ;;  %v638_v10 = vld [vmem:[%s800_s11 + $0x20] sm:$0xff]   ;;  %v640_v12 = vld [vmem:[%s800_s11 + $0x28] sm:$0xff]   ;;  %v642_v14 = vld [vmem:[%s800_s11 + $0x30] sm:$0xff]  }
  0x1a   : > { %v643_v15 = vld [vmem:[%s800_s11 + $0x18] sm:$0xff]   ;;  %p648_p13 = pneg %p647_p12 }
  0x1b   : > { %v644_v16 = vld [vmem:[%s800_s11 + $0x38] sm:$0xff]   ;;  %s710_s11 = smov [#allocation2]  }
  0x1c   : > { %321 = vmatpush1.bf16.msra.mxu0 %v636_v8  ;;  %582 = vmatpush1.bf16.msra.mxu1 %v636_v8  ;;  %s649_s17 = sshll.u32 %s710_s11, 4  ;;  %s650_s17 = int_to_ptr.vmem [resolvable:$false] %s649_s17 }
  0x1d   : > { %s651_s19 = scalar_lea.vmem %s650_s17, 8192  ;;  %p652_p0 = scmp.lt.s32.totalorder %s902_s6, %s650_s17 }
  0x1e   : > { %p653_p1 = scmp.lt.s32.totalorder %s651_s19, %s645_s10 }
  0x1f   : > { %559 = vmatmul.mubr.msk.bf16.vlgmr.msra.gmra.mrb[0].mxu0 %vm289_vm0, %v637_v9  ;;  %563 = vmatmul.mubr.msk.bf16.vlgmr.msra.gmra.mrb[0].mxu1 %vm289_vm0, %v638_v10 }
  0x20   : > { %356 = vmatprep.mubr.bf16.mxu0 %v709_v2  ;;  %396 = vmatprep.mubr.bf16.mxu1 %v709_v2  ;;  %p654_p2 = por %p653_p1, %p652_p0 }
  0x22   : > { %p655_p3 = pnand %p654_p2, %p648_p13 }
  0x27   : > { %560 = vmatmul.mubr.msk.bf16.gmra.mrb[4].mxu0 %vm289_vm0, %v639_v11  ;;  %564 = vmatmul.mubr.msk.bf16.gmra.mrb[4].mxu1 %vm289_vm0, %v640_v12 }
  0x28   : > { %366 = vmatprep.mubr.bf16.mxu0 %v709_v2  ;;  %406 = vmatprep.mubr.bf16.mxu1 %v709_v2 }
  0x2f   : > { %561 = vmatmul.mubr.msk.bf16.gmra.mrb[8].mxu0 %vm289_vm0, %v641_v13  ;;  %565 = vmatmul.mubr.msk.bf16.gmra.mrb[8].mxu1 %vm289_vm0, %v642_v14 }
  0x30   : > { %376 = vmatprep.mubr.bf16.mxu0 %v709_v2  ;;  %416 = vmatprep.mubr.bf16.mxu1 %v709_v2 }
  0x37   : > { %562 = vmatmul.mubr.msk.bf16.gmra.mrb[12].mxu0 %vm289_vm0, %v643_v15  ;;  %566 = vmatmul.mubr.msk.bf16.gmra.mrb[12].mxu1 %vm289_vm0, %v644_v16 }
  0xf2   : > { %v348_v24 = vpop.f32.mrb[0].mxu0  ;;  %v388_v25 = vpop.f32.mrb[0].mxu1 }
  0xf3   : > { %v349_v26 = vadd.f32 %v348_v24, %v833_v22  ;;  %v389_v27 = vadd.f32 %v388_v25, %v833_v22  ;;  %v350_v28 = vpop.f32.mrb[1].mxu0  ;;  %v390_v29 = vpop.f32.mrb[1].mxu1 }
  0xf4   : > { %v351_v30 = vadd.f32 %v350_v28, %v835_v23  ;;  %v391_v31 = vadd.f32 %v390_v29, %v835_v23  ;;  %v352_v32 = vpop.f32.mrb[2].mxu0  ;;  %v392_v33 = vpop.f32.mrb[2].mxu1 }
  0xf5   : > { %427 = vst [vmem:[%s841_s4] sm:$0xff] %v349_v26  ;;  %443 = vst [vmem:[%s841_s4 + $0x80] sm:$0xff] %v389_v27  ;;  %v353_v34 = vadd.f32 %v352_v32, %v833_v22  ;;  %v393_v35 = vadd.f32 %v392_v33, %v833_v22  ;;  %v354_v36 = vpop.f32.mrb[3].mxu0  ;;  %v394_v37 = vpop.f32.mrb[3].mxu1 }
  0xf6   : > { %428 = vst [vmem:[%s841_s4 + $0x8] sm:$0xff] %v351_v30  ;;  %444 = vst [vmem:[%s841_s4 + $0x88] sm:$0xff] %v391_v31  ;;  %v355_v38 = vadd.f32 %v354_v36, %v835_v23  ;;  %v395_v39 = vadd.f32 %v394_v37, %v835_v23 }
  0xf7   : > { %429 = vst [vmem:[%s841_s4 + $0x10] sm:$0xff] %v353_v34  ;;  %445 = vst [vmem:[%s841_s4 + $0x90] sm:$0xff] %v393_v35 }
  0xf8   : > { %430 = vst [vmem:[%s841_s4 + $0x18] sm:$0xff] %v355_v38  ;;  %446 = vst [vmem:[%s841_s4 + $0x98] sm:$0xff] %v395_v39 }
  0xfa   : > { %v358_v40 = vpop.f32.mrb[4].mxu0  ;;  %v398_v41 = vpop.f32.mrb[4].mxu1 }
  0xfb   : > { %v359_v42 = vadd.f32 %v358_v40, %v833_v22  ;;  %v399_v43 = vadd.f32 %v398_v41, %v833_v22  ;;  %v360_v44 = vpop.f32.mrb[5].mxu0  ;;  %v400_v45 = vpop.f32.mrb[5].mxu1 }
  0xfc   : > { %v361_v46 = vadd.f32 %v360_v44, %v835_v23  ;;  %v401_v47 = vadd.f32 %v400_v45, %v835_v23  ;;  %v362_v48 = vpop.f32.mrb[6].mxu0  ;;  %v402_v49 = vpop.f32.mrb[6].mxu1 }
  0xfd   : > { %431 = vst [vmem:[%s841_s4 + $0x20] sm:$0xff] %v359_v42  ;;  %447 = vst [vmem:[%s841_s4 + $0xa0] sm:$0xff] %v399_v43  ;;  %v363_v50 = vadd.f32 %v362_v48, %v833_v22  ;;  %v403_v51 = vadd.f32 %v402_v49, %v833_v22  ;;  %v364_v52 = vpop.f32.mrb[7].mxu0  ;;  %v404_v53 = vpop.f32.mrb[7].mxu1 }
  0xfe   : > { %432 = vst [vmem:[%s841_s4 + $0x28] sm:$0xff] %v361_v46  ;;  %448 = vst [vmem:[%s841_s4 + $0xa8] sm:$0xff] %v401_v47  ;;  %v365_v54 = vadd.f32 %v364_v52, %v835_v23  ;;  %v405_v55 = vadd.f32 %v404_v53, %v835_v23 }
  0xff   : > { %433 = vst [vmem:[%s841_s4 + $0x30] sm:$0xff] %v363_v50  ;;  %449 = vst [vmem:[%s841_s4 + $0xb0] sm:$0xff] %v403_v51 }
 0x100   : > { %434 = vst [vmem:[%s841_s4 + $0x38] sm:$0xff] %v365_v54  ;;  %450 = vst [vmem:[%s841_s4 + $0xb8] sm:$0xff] %v405_v55 }
 0x102   : > { %v368_v56 = vpop.f32.mrb[8].mxu0  ;;  %v408_v57 = vpop.f32.mrb[8].mxu1 }
 0x103   : > { %v369_v58 = vadd.f32 %v368_v56, %v833_v22  ;;  %v409_v59 = vadd.f32 %v408_v57, %v833_v22  ;;  %v370_v60 = vpop.f32.mrb[9].mxu0  ;;  %v410_v61 = vpop.f32.mrb[9].mxu1 }
 0x104   : > { %v371_v62 = vadd.f32 %v370_v60, %v835_v23  ;;  %v411_v63 = vadd.f32 %v410_v61, %v835_v23  ;;  %v372_v0 = vpop.f32.mrb[10].mxu0  ;;  %v412_v1 = vpop.f32.mrb[10].mxu1 }
 0x105   : > { %435 = vst [vmem:[%s841_s4 + $0x40] sm:$0xff] %v369_v58  ;;  %451 = vst [vmem:[%s841_s4 + $0xc0] sm:$0xff] %v409_v59  ;;  %v373_v2 = vadd.f32 %v372_v0, %v833_v22  ;;  %v413_v3 = vadd.f32 %v412_v1, %v833_v22  ;;  %v374_v4 = vpop.f32.mrb[11].mxu0  ;;  %v414_v5 = vpop.f32.mrb[11].mxu1 }
 0x106   : > { %436 = vst [vmem:[%s841_s4 + $0x48] sm:$0xff] %v371_v62  ;;  %452 = vst [vmem:[%s841_s4 + $0xc8] sm:$0xff] %v411_v63  ;;  %v375_v6 = vadd.f32 %v374_v4, %v835_v23  ;;  %v415_v7 = vadd.f32 %v414_v5, %v835_v23 }
 0x107   : > { %437 = vst [vmem:[%s841_s4 + $0x50] sm:$0xff] %v373_v2  ;;  %453 = vst [vmem:[%s841_s4 + $0xd0] sm:$0xff] %v413_v3 }
 0x108   : > { %438 = vst [vmem:[%s841_s4 + $0x58] sm:$0xff] %v375_v6  ;;  %454 = vst [vmem:[%s841_s4 + $0xd8] sm:$0xff] %v415_v7 }
 0x10a   : > { %v378_v8 = vpop.f32.mrb[12].mxu0  ;;  %v418_v9 = vpop.f32.mrb[12].mxu1 }
 0x10b   : > { %v379_v10 = vadd.f32 %v378_v8, %v833_v22  ;;  %v419_v11 = vadd.f32 %v418_v9, %v833_v22  ;;  %v380_v12 = vpop.f32.mrb[13].mxu0  ;;  %v420_v13 = vpop.f32.mrb[13].mxu1 }
 0x10c   : > { %v381_v14 = vadd.f32 %v380_v12, %v835_v23  ;;  %v421_v15 = vadd.f32 %v420_v13, %v835_v23  ;;  %v382_v16 = vpop.f32.mrb[14].mxu0  ;;  %v422_v17 = vpop.f32.mrb[14].mxu1 }
 0x10d   : > { %439 = vst [vmem:[%s841_s4 + $0x60] sm:$0xff] %v379_v10  ;;  %455 = vst [vmem:[%s841_s4 + $0xe0] sm:$0xff] %v419_v11  ;;  %v383_v18 = vadd.f32 %v382_v16, %v833_v22  ;;  %v423_v19 = vadd.f32 %v422_v17, %v833_v22  ;;  %v384_v20 = vpop.f32.mrb[15].mxu0  ;;  %v424_v21 = vpop.f32.mrb[15].mxu1 }
 0x10e   : > { %440 = vst [vmem:[%s841_s4 + $0x68] sm:$0xff] %v381_v14  ;;  %456 = vst [vmem:[%s841_s4 + $0xe8] sm:$0xff] %v421_v15  ;;  %v385_v24 = vadd.f32 %v384_v20, %v835_v23  ;;  %v425_v25 = vadd.f32 %v424_v21, %v835_v23 }
 0x10f   : > { %441 = vst [vmem:[%s841_s4 + $0x70] sm:$0xff] %v383_v18  ;;  %457 = vst [vmem:[%s841_s4 + $0xf0] sm:$0xff] %v423_v19 }
 0x110   : > { %442 = vst [vmem:[%s841_s4 + $0x78] sm:$0xff] %v385_v24  ;;  %458 = vst [vmem:[%s841_s4 + $0xf8] sm:$0xff] %v425_v25 }
 0x111   : > { %658 = shalt.err (!%p655_p3)
}
 0x112   : > { %s659_s20 = scalar_lea.hbm %s900_s8, 4096  ;;  %s663_s26 = scalar_lea.hbm %s958_s3, 16384 }
 0x113   : > { %p660_p4 = scmp.ne.s32.totalorder %s900_s8, %s659_s20  ;;  %p664_p9 = scmp.lt.u32.totalorder %s900_s8, %s958_s3 }
 0x114   : > { %p665_p10 = scmp.lt.u32.totalorder %s663_s26, %s659_s20  ;;  %p667_p12 = scmp.lt.u32.totalorder %s659_s20, %s900_s8 }
 0x115   : > { %p661_p7 = pnand %p660_p4, %p771_p5 }
 0x116   : > { %p666_p11 = por %p665_p10, %p664_p9 }
 0x117   : > { %p662_p8 = pneg %p661_p7 }
 0x118   : > { %p668_p13 = por %p667_p12, %p666_p11 }
 0x11a   : > { %p669_p0 = pnand %p668_p13, %p662_p8 }
 0x11c   : > { %672 = shalt.err (!%p669_p0)
}
 0x11d   : > { %s711_s29 = smov 256   ;;  %s712_s30 = smov 16  }
 0x11e   : > { %583 = dma.vmem_to_hbm [thread:$0]  (%p771_p5), %s902_s6, 4096, %s900_s8, %s914_s9, %s711_s29, %s711_s29, %s712_s30  }
 0x11f PF: > { %p589_p1 = scmp.ge.s32.totalorder %s707_s15, 2  ;;  %s489_s4 = sand.u32 1, %s695_s12  }
 0x120   : > { %s490_s5 = scalar_lea.sflag [#allocation3], %s489_s4 }
 0x121   : > { %p586_p2 = pnand %p589_p1, %p775_p6 }
 0x123   : > { %690 = dma.done.wait (!%p586_p2), %s490_s5, 4096  }
 0x124   : > { %692 = vsyncadd (!%p586_p2), %s490_s5, 4294963200  ;;  %p13_p3 = scmp.ge.s32.totalorder %s758_s18, 6   ;;  %s961_s12 = smov %s699_s13 }
 0x125   : > { %s962_s13 = smov %s703_s14  ;;  %s963_s14 = smov %s769_s21 }
 0x126   : > { %s964_s15 = smov %s758_s18  ;;  %15 = sbr.rel (!%p13_p3) target bundleno = 3 (0x3), region = 67 }
 0x12d   :  { %495 = vsyncpa [#allocation3], 1 }
 0x12e   :  { %497 = vsyncpa [#allocation3 + $0x1], 1 }

</bundles_post_ra>
